<compile_context>
chip_gen: v6e
topology: v6e:2x2x1
jax: 0.10.0
libtpu: 0.0.40
codegen_flags: <defaults>
</compile_context>

<pallas_src>
import functools

import jax
import jax.numpy as jnp
from jax.experimental import pallas as pl
from jax.experimental.pallas import tpu as pltpu


def _round_up(x, m):
    return ((x + m - 1) // m) * m


def _mlp_kernel(x_ref, w1, b1, w2, b2, w3, b3, w4, b4, out_ref, *, eval_mode):
    """4-layer MLP on one batch tile, batch-on-lanes layout.

    x_ref:  (input_dim, bm)     feature on sublanes, batch on lanes
    w1..w3: (out, in)           torch nn.Linear weight layout
    b1..b3: (out, 1)  f32       broadcast across lanes (batch)
    w4:     (H, 1), b4: (1, 1)  final linear as mul + sublane reduce
    out:    (1, bm)             lane-dense output row
    """
    x = x_ref[...]
    # layer 1: (H, in) @ (in, bm) -> (H, bm), f32 accumulation
    h = jnp.dot(w1[...], x.astype(w1.dtype),
                preferred_element_type=jnp.float32) + b1[...]
    h = jnp.maximum(h, 0.0)
    # layer 2
    h = jnp.dot(w2[...], h.astype(w2.dtype),
                preferred_element_type=jnp.float32) + b2[...]
    h = jnp.maximum(h, 0.0)
    # layer 3
    h = jnp.dot(w3[...], h.astype(w3.dtype),
                preferred_element_type=jnp.float32) + b3[...]
    h = jnp.maximum(h, 0.0)
    # layer 4 (output dim 1): VPU mul + XLU sublane reduce -> (1, bm)
    y = jnp.sum(h * w4[...].astype(jnp.float32), axis=0, keepdims=True) + b4[...]
    if eval_mode:
        # torch.clamp(pred, 0.0, 1.0) in eval mode
        y = jnp.clip(y, 0.0, 1.0)
    out_ref[...] = y.astype(out_ref.dtype)


def set_feasibility_predictor_forward(obs_goal, params, *, eval_mode=True,
                                      bm=512, use_bf16=False):
    """Pallas forward pass. obs_goal: [B, input_dim] f32 -> pred: [B] f32."""
    B, input_dim = obs_goal.shape
    w1, b1, w2, b2, w3, b3, w4, b4 = params

    # Lane-dense batch tile: multiple of 128, capped by the padded batch.
    bm = _round_up(max(bm, 128), 128)
    bm_eff = min(bm, _round_up(B, 128))
    padded_B = _round_up(B, bm_eff)

    dot_dtype = jnp.bfloat16 if use_bf16 else jnp.float32

    # Batch-on-lanes: present x transposed [input_dim, padded_B]; padded rows
    # are zeros and are sliced off after the kernel.
    x_t = jnp.pad(obs_goal, ((0, padded_B - B), (0, 0))).T.astype(dot_dtype)
    w1c, w2c, w3c, w4c = (w.astype(dot_dtype) for w in (w1, w2, w3, w4))
    # biases stay f32: f32 accumulation + f32 VPU elementwise on all gens

    full2d = lambda a: pl.BlockSpec(a.shape, lambda i: (0, 0))

    out = pl.pallas_call(
        functools.partial(_mlp_kernel, eval_mode=eval_mode),
        out_shape=jax.ShapeDtypeStruct((1, padded_B), jnp.float32),
        grid_spec=pltpu.PrefetchScalarGridSpec(
            num_scalar_prefetch=0,
            grid=(padded_B // bm_eff,),
            in_specs=[
                pl.BlockSpec((input_dim, bm_eff), lambda i: (0, i)),  # x tile
                full2d(w1c), full2d(b1),
                full2d(w2c), full2d(b2),
                full2d(w3c), full2d(b3),
                full2d(w4c), full2d(b4),
            ],
            out_specs=pl.BlockSpec((1, bm_eff), lambda i: (0, i)),
        ),
        compiler_params=pltpu.CompilerParams(
            dimension_semantics=("parallel",)),
    )(x_t, w1c, b1, w2c, b2, w3c, b3, w4c, b4)
    return out[0, :B]


def init_params(key, input_dim, hidden_dim):
    """Deterministic synthetic weights (stand-in for weight_init).

    Layout: w1..w3 in torch (out, in); biases (out, 1); final layer weight
    stored as a (H, 1) column.
    """
    dims = [(input_dim, hidden_dim),
            (hidden_dim, hidden_dim),
            (hidden_dim, hidden_dim),
            (hidden_dim, 1)]
    params = []
    for din, dout in dims:
        key, kw, kb = jax.random.split(key, 3)
        scale = 1.0 / jnp.sqrt(jnp.float32(din))
        if dout == 1:
            w = jax.random.uniform(kw, (din, dout), jnp.float32, -scale, scale)
        else:
            w = jax.random.uniform(kw, (dout, din), jnp.float32, -scale, scale)
        b = jax.random.uniform(kb, (dout, 1), jnp.float32, -scale, scale)
        params += [w, b]
    return tuple(params)


def _reference_forward(obs_goal, params, eval_mode=True):
    """Pure-JAX reference for correctness checking."""
    w1, b1, w2, b2, w3, b3, w4, b4 = params
    h = jnp.maximum(obs_goal @ w1.T + b1.T, 0.0)
    h = jnp.maximum(h @ w2.T + b2.T, 0.0)
    h = jnp.maximum(h @ w3.T + b3.T, 0.0)
    y = (h @ w4 + b4.T)[:, 0]
    if eval_mode:
        y = jnp.clip(y, 0.0, 1.0)
    return y


if __name__ == "__main__":
    # args: dimz=5 -> dimu=8; obs_goal holds 2 units -> input_dim=16;
    # fea_latent_dim(hidden)=32; bin_succ=False; t_relative=False.
    dimz = 5
    dimu = dimz + 3          # 8
    input_dim = 2 * dimu     # 16
    hidden_dim = 32

    key = jax.random.PRNGKey(0)
    k_x, k_p = jax.random.split(key)
    params = init_params(k_p, input_dim, hidden_dim)

    # Main case: batch not a multiple of the tile -> exercises padding and a
    # multi-step "parallel" grid (v7x megacore friendly).
    B = 1000
    obs_goal = jax.random.normal(k_x, (B, input_dim), jnp.float32)
    ref = _reference_forward(obs_goal, params, eval_mode=True)

    pred = jax.block_until_ready(
        set_feasibility_predictor_forward(obs_goal, params, eval_mode=True,
                                          bm=256, use_bf16=False))
    assert pred.shape == (B,)
    assert jnp.allclose(pred, ref, atol=1e-5, rtol=1e-5), (pred[:8], ref[:8])

    # Tiny-batch path (B < 128 -> single 128-lane tile, padded).
    B_small = 8
    pred_s = jax.block_until_ready(
        set_feasibility_predictor_forward(obs_goal[:B_small], params,
                                          eval_mode=True))
    assert pred_s.shape == (B_small,)
    assert jnp.allclose(pred_s, ref[:B_small], atol=1e-5, rtol=1e-5)

    # bf16-streamed variant (halves HBM bytes of x on v6e/v7x); f32 accumulate,
    # so only a small numerical delta vs. the f32 reference.
    pred_bf16 = jax.block_until_ready(
        set_feasibility_predictor_forward(obs_goal, params, eval_mode=True,
                                          bm=256, use_bf16=True))
    assert jnp.allclose(pred_bf16, ref, atol=3e-2, rtol=3e-2)

    print("KERNEL_OK")
</pallas_src>

<mosaic_0001>
module attributes {stable_mosaic.version = 11 : i64} {
  func.func @_mlp_kernel(%arg0: i32, %arg1: memref<16x256xf32, #tpu.memory_space<vmem>>, %arg2: memref<32x16xf32, #tpu.memory_space<vmem>>, %arg3: memref<32x1xf32, #tpu.memory_space<vmem>>, %arg4: memref<32x32xf32, #tpu.memory_space<vmem>>, %arg5: memref<32x1xf32, #tpu.memory_space<vmem>>, %arg6: memref<32x32xf32, #tpu.memory_space<vmem>>, %arg7: memref<32x1xf32, #tpu.memory_space<vmem>>, %arg8: memref<32x1xf32, #tpu.memory_space<vmem>>, %arg9: memref<1x1xf32, #tpu.memory_space<vmem>>, %arg10: memref<1x256xf32, #tpu.memory_space<vmem>>) attributes {dimension_semantics = [#tpu.dimension_semantics<parallel>], iteration_bounds = array<i64: 4>, scalar_prefetch = 0 : i64, scratch_operands = 0 : i64, tpu.core_type = #tpu.core_type<tc>, window_params = [{transform_indices = @transform_0, window_bounds = array<i64: 16, 256>}, {pipeline_mode = #tpu.pipeline_mode<synchronous>, transform_indices = @transform_1, window_bounds = array<i64: 32, 16>}, {pipeline_mode = #tpu.pipeline_mode<synchronous>, transform_indices = @transform_2, window_bounds = array<i64: 32, 1>}, {pipeline_mode = #tpu.pipeline_mode<synchronous>, transform_indices = @transform_3, window_bounds = array<i64: 32, 32>}, {pipeline_mode = #tpu.pipeline_mode<synchronous>, transform_indices = @transform_4, window_bounds = array<i64: 32, 1>}, {pipeline_mode = #tpu.pipeline_mode<synchronous>, transform_indices = @transform_5, window_bounds = array<i64: 32, 32>}, {pipeline_mode = #tpu.pipeline_mode<synchronous>, transform_indices = @transform_6, window_bounds = array<i64: 32, 1>}, {pipeline_mode = #tpu.pipeline_mode<synchronous>, transform_indices = @transform_7, window_bounds = array<i64: 32, 1>}, {pipeline_mode = #tpu.pipeline_mode<synchronous>, transform_indices = @transform_8, window_bounds = array<i64: 1, 1>}, {transform_indices = @transform_9, window_bounds = array<i64: 1, 256>}]} {
    %c0 = arith.constant 0 : index
    %c0_0 = arith.constant 0 : index
    %0 = vector.load %arg1[%c0, %c0_0] : memref<16x256xf32, #tpu.memory_space<vmem>>, vector<16x256xf32>
    %c0_1 = arith.constant 0 : index
    %c0_2 = arith.constant 0 : index
    %1 = vector.load %arg2[%c0_1, %c0_2] : memref<32x16xf32, #tpu.memory_space<vmem>>, vector<32x16xf32>
    %cst = arith.constant dense<0.000000e+00> : vector<32x256xf32>
    %2 = tpu.matmul %1, %0, %cst {dimension_numbers = #tpu.dot_dimension_numbers<[1], [0], [0], [1], [0, 0, 1, 1], [], []>} : vector<32x16xf32>, vector<16x256xf32>, vector<32x256xf32> -> vector<32x256xf32>
    %c0_3 = arith.constant 0 : index
    %c0_4 = arith.constant 0 : index
    %3 = vector.load %arg3[%c0_3, %c0_4] : memref<32x1xf32, #tpu.memory_space<vmem>>, vector<32x1xf32>
    %4 = vector.broadcast %3 : vector<32x1xf32> to vector<32x256xf32>
    %5 = arith.addf %2, %4 : vector<32x256xf32>
    %cst_5 = arith.constant 0.000000e+00 : f32
    %6 = vector.broadcast %cst_5 : f32 to vector<32x256xf32>
    %7 = arith.maximumf %5, %6 : vector<32x256xf32>
    %c0_6 = arith.constant 0 : index
    %c0_7 = arith.constant 0 : index
    %8 = vector.load %arg4[%c0_6, %c0_7] : memref<32x32xf32, #tpu.memory_space<vmem>>, vector<32x32xf32>
    %cst_8 = arith.constant dense<0.000000e+00> : vector<32x256xf32>
    %9 = tpu.matmul %8, %7, %cst_8 {dimension_numbers = #tpu.dot_dimension_numbers<[1], [0], [0], [1], [0, 0, 1, 1], [], []>} : vector<32x32xf32>, vector<32x256xf32>, vector<32x256xf32> -> vector<32x256xf32>
    %c0_9 = arith.constant 0 : index
    %c0_10 = arith.constant 0 : index
    %10 = vector.load %arg5[%c0_9, %c0_10] : memref<32x1xf32, #tpu.memory_space<vmem>>, vector<32x1xf32>
    %11 = vector.broadcast %10 : vector<32x1xf32> to vector<32x256xf32>
    %12 = arith.addf %9, %11 : vector<32x256xf32>
    %cst_11 = arith.constant 0.000000e+00 : f32
    %13 = vector.broadcast %cst_11 : f32 to vector<32x256xf32>
    %14 = arith.maximumf %12, %13 : vector<32x256xf32>
    %c0_12 = arith.constant 0 : index
    %c0_13 = arith.constant 0 : index
    %15 = vector.load %arg6[%c0_12, %c0_13] : memref<32x32xf32, #tpu.memory_space<vmem>>, vector<32x32xf32>
    %cst_14 = arith.constant dense<0.000000e+00> : vector<32x256xf32>
    %16 = tpu.matmul %15, %14, %cst_14 {dimension_numbers = #tpu.dot_dimension_numbers<[1], [0], [0], [1], [0, 0, 1, 1], [], []>} : vector<32x32xf32>, vector<32x256xf32>, vector<32x256xf32> -> vector<32x256xf32>
    %c0_15 = arith.constant 0 : index
    %c0_16 = arith.constant 0 : index
    %17 = vector.load %arg7[%c0_15, %c0_16] : memref<32x1xf32, #tpu.memory_space<vmem>>, vector<32x1xf32>
    %18 = vector.broadcast %17 : vector<32x1xf32> to vector<32x256xf32>
    %19 = arith.addf %16, %18 : vector<32x256xf32>
    %cst_17 = arith.constant 0.000000e+00 : f32
    %20 = vector.broadcast %cst_17 : f32 to vector<32x256xf32>
    %21 = arith.maximumf %19, %20 : vector<32x256xf32>
    %c0_18 = arith.constant 0 : index
    %c0_19 = arith.constant 0 : index
    %22 = vector.load %arg8[%c0_18, %c0_19] : memref<32x1xf32, #tpu.memory_space<vmem>>, vector<32x1xf32>
    %23 = vector.broadcast %22 : vector<32x1xf32> to vector<32x256xf32>
    %24 = arith.mulf %21, %23 : vector<32x256xf32>
    %cst_20 = arith.constant dense<0.000000e+00> : vector<256xf32>
    %25 = vector.multi_reduction <add>, %24, %cst_20 [0] : vector<32x256xf32> to vector<256xf32>
    %26 = vector.shape_cast %25 : vector<256xf32> to vector<1x256xf32>
    %c0_21 = arith.constant 0 : index
    %c0_22 = arith.constant 0 : index
    %27 = vector.load %arg9[%c0_21, %c0_22] : memref<1x1xf32, #tpu.memory_space<vmem>>, vector<1x1xf32>
    %28 = vector.broadcast %27 : vector<1x1xf32> to vector<1x256xf32>
    %29 = arith.addf %26, %28 : vector<1x256xf32>
    %cst_23 = arith.constant 0.000000e+00 : f32
    %cst_24 = arith.constant 1.000000e+00 : f32
    %30 = vector.broadcast %cst_23 : f32 to vector<1x256xf32>
    %31 = arith.maximumf %30, %29 : vector<1x256xf32>
    %32 = vector.broadcast %cst_24 : f32 to vector<1x256xf32>
    %33 = arith.minimumf %32, %31 : vector<1x256xf32>
    %c0_25 = arith.constant 0 : index
    %c0_26 = arith.constant 0 : index
    %34 = vector.load %arg10[%c0_25, %c0_26] : memref<1x256xf32, #tpu.memory_space<vmem>>, vector<1x256xf32>
    tpu.vector_store %arg10[%c0_25, %c0_26], %33 {strides = array<i32>} : memref<1x256xf32, #tpu.memory_space<vmem>>, vector<1x256xf32>,
    return
  }
  func.func @transform_0(%arg0: i32) -> (i32, i32) {
    %c0_i32 = arith.constant 0 : i32
    %c0_i32_0 = arith.constant 0 : i32
    return %c0_i32, %arg0 : i32, i32
  }
  func.func @transform_1(%arg0: i32) -> (i32, i32) {
    %c0_i32 = arith.constant 0 : i32
    %c0_i32_0 = arith.constant 0 : i32
    %c0_i32_1 = arith.constant 0 : i32
    return %c0_i32, %c0_i32_0 : i32, i32
  }
  func.func @transform_2(%arg0: i32) -> (i32, i32) {
    %c0_i32 = arith.constant 0 : i32
    %c0_i32_0 = arith.constant 0 : i32
    %c0_i32_1 = arith.constant 0 : i32
    return %c0_i32, %c0_i32_0 : i32, i32
  }
  func.func @transform_3(%arg0: i32) -> (i32, i32) {
    %c0_i32 = arith.constant 0 : i32
    %c0_i32_0 = arith.constant 0 : i32
    %c0_i32_1 = arith.constant 0 : i32
    return %c0_i32, %c0_i32_0 : i32, i32
  }
  func.func @transform_4(%arg0: i32) -> (i32, i32) {
    %c0_i32 = arith.constant 0 : i32
    %c0_i32_0 = arith.constant 0 : i32
    %c0_i32_1 = arith.constant 0 : i32
    return %c0_i32, %c0_i32_0 : i32, i32
  }
  func.func @transform_5(%arg0: i32) -> (i32, i32) {
    %c0_i32 = arith.constant 0 : i32
    %c0_i32_0 = arith.constant 0 : i32
    %c0_i32_1 = arith.constant 0 : i32
    return %c0_i32, %c0_i32_0 : i32, i32
  }
  func.func @transform_6(%arg0: i32) -> (i32, i32) {
    %c0_i32 = arith.constant 0 : i32
    %c0_i32_0 = arith.constant 0 : i32
    %c0_i32_1 = arith.constant 0 : i32
    return %c0_i32, %c0_i32_0 : i32, i32
  }
  func.func @transform_7(%arg0: i32) -> (i32, i32) {
    %c0_i32 = arith.constant 0 : i32
    %c0_i32_0 = arith.constant 0 : i32
    %c0_i32_1 = arith.constant 0 : i32
    return %c0_i32, %c0_i32_0 : i32, i32
  }
  func.func @transform_8(%arg0: i32) -> (i32, i32) {
    %c0_i32 = arith.constant 0 : i32
    %c0_i32_0 = arith.constant 0 : i32
    %c0_i32_1 = arith.constant 0 : i32
    return %c0_i32, %c0_i32_0 : i32, i32
  }
  func.func @transform_9(%arg0: i32) -> (i32, i32) {
    %c0_i32 = arith.constant 0 : i32
    %c0_i32_0 = arith.constant 0 : i32
    return %c0_i32, %arg0 : i32, i32
  }
}

</mosaic_0001>

<bundles_post_ra>
// kernel: tpu_custom_call.1
= control target key start
LH: loop header
LB: loop body
LE: loop exit
PB: predicated region body
PF: predicated region fallthrough
CT: control target
= control target key end

     0   :  { %s1431_s0 = inlined_call_operand.vmem [shape: f32[16,1024], index: 0, kind: input, shape index: {}]   ;;  %s1432_s1 = inlined_call_operand.vmem [shape: f32[32,16], index: 1, kind: input, shape index: {}]   ;;  %s1433_s2 = inlined_call_operand.vmem [shape: f32[32,1], index: 2, kind: input, shape index: {}]   ;;  %s1434_s3 = inlined_call_operand.vmem [shape: f32[32,32], index: 3, kind: input, shape index: {}]   ;;  %s1435_s4 = inlined_call_operand.vmem [shape: f32[32,1], index: 4, kind: input, shape index: {}]   ;;  %s1436_s5 = inlined_call_operand.hbm [shape: f32[32,32], index: 5, kind: input, shape index: {}]   ;;  %s1437_s6 = inlined_call_operand.vmem [shape: f32[32,1], index: 6, kind: input, shape index: {}]   ;;  %s1438_s7 = inlined_call_operand.vmem [shape: f32[32,1], index: 7, kind: input, shape index: {}]   ;;  %s1439_s8 = inlined_call_operand.<no memory space> [shape: f32[1,1], index: 8, kind: input, shape index: {}]   ;;  %s1440_s9 = inlined_call_operand.hbm [shape: f32[1,1024], index: 9, kind: output, shape index: {}]  }
   0x1   :  { %v14_v0 = vstv %s1439_s8 }
   0x2   :  { %15 = vst [vmem:[#allocation2] sm:$0x1] %v14_v0 }
   0x3   :  { %16 = vsyncpa [#allocation5], 0 }
   0x4   :  { %17 = vsyncpa [#allocation6], 0 }
   0x5   :  { %19 = vsyncpa [#allocation6 + $0x1], 0  ;;  %s1217_s11 = smov 0   ;;  %s1219_s12 = smov 0  }
   0x6   :  { %s1221_s13 = smov 0   ;;  %s1223_s14 = smov 0  }
   0x7 LB: > { %s1238_s8 = sadd.s32 4294967295, %s1155_s14   ;;  %s974_s15 = sadd.s32 4294967294, %s1155_s14   ;;  %s1155_s14 = sphi %s1223_s14, %s1451_s14   ;;  %s1151_s13 = sphi %s1221_s13, %s1450_s13   ;;  %s1147_s12 = sphi %s1219_s12, %s1449_s12   ;;  %s1143_s11 = sphi %s1217_s11, %s1448_s11  }
   0x8   : > { %s1242_s16 = sadd.s32 1, %s1155_s14   ;;  %s32_s17 = sadd.s32 1, %s1151_s13 }
   0x9   : > { %s29_s18 = ssub.s32 %s1155_s14, %s1242_s16  ;;  %p39_p0 = scmp.ne.s32.totalorder %s1151_s13, %s1147_s12 }
   0xa   : > { %p30_p1 = scmp.eq.s32.totalorder %s29_s18, 0  ;;  %p40_p2 = scmp.eq.s32.totalorder %s1155_s14, 0 }
   0xb   : > { %p237_p3 = scmp.eq.s32.totalorder %s1238_s8, 3  ;;  %p242_p4 = scmp.ne.s32.totalorder %s1147_s12, %s1143_s11 }
   0xc   : > { %s1254_s19 = scalar_select %p30_p1, %s1151_s13, %s32_s17  }
   0xd   : > { %p1256_p5 = por %p40_p2, %p39_p0  ;;  %p1260_p6 = por %p237_p3, %p39_p0 }
   0xe   : > { %p243_p7 = scmp.eq.s32.totalorder %s974_s15, 3  ;;  %p975_p8 = scmp.ge.s32.totalorder %s1155_s14, 1 }
   0xf   : > { %s1443_s21 = scalar_select %p1260_p6, 1, 0 }
  0x10   : > { %p250_p9 = scmp.lt.s32.totalorder %s1155_s14, 5  ;;  %p1266_p10 = por %p243_p7, %p242_p4 }
  0x11   : > { %p1022_p11 = scmp.eq.s32.totalorder %s1238_s8, 0  ;;  %s1157_s24 = smov [#allocation4]  }
  0x12   : > { %s1444_s22 = scalar_select %p1266_p10, 1, 0 }
  0x13   : > { %p1271_p12 = pnand %p975_p8, %p250_p9  ;;  %s274_s25 = sshll.u32 %s1157_s24, 4  ;;  %s275_s25 = int_to_ptr.vmem [resolvable:$true] %s274_s25 }
  0x14   : > { %s1076_s26 = scalar_lea.vmem %s275_s25, 512  ;;  %p1084_p7 = scmp.lt.s32.totalorder %s275_s25, %s275_s25 }
  0x15   : > { %p1014_p13 = pneg %p1271_p12  ;;  %p1077_p2 = scmp.ne.s32.totalorder %s275_s25, %s1076_s26 }
  0x16   : > { %p1085_p10 = scmp.lt.s32.totalorder %s1076_s26, %s1076_s26 }
  0x17   : > { %p1015_p0 = pnand %p1022_p11, %p1014_p13 }
  0x18   : > { %p1086_p6 = por %p1085_p10, %p1084_p7 }
  0x19   : > { %p1067_p1 = pneg %p1015_p0 }
  0x1b   : > { %p1079_p3 = pnand %p1077_p2, %p1067_p1 }
  0x1d   : > { %p1080_p4 = pneg %p1079_p3 }
  0x1f   : > { %p1087_p8 = pnand %p1086_p6, %p1080_p4 }
  0x21   : > { %1090 = shalt.err (!%p1087_p8)
}
  0x22   : > { %s1158_s27 = smov 128   ;;  %s1159_s28 = smov 8  }
  0x23   : > { %1017 = dma.hbm_to_vmem [thread:$0]  (!%p1015_p0), %s1436_s5, 512, %s275_s25, [#allocation5], %s1158_s27, %s1158_s27, %s1159_s28  }
  0x24   : > { %p977_p9 = scmp.ge.s32.totalorder %s1155_s14, 4 }
  0x26   : > { %293 = sbr.rel (%p977_p9) target bundleno = 49 (0x31), region = 48 }
  0x2b   : > { %296 = sbr.rel (!%p1256_p5) target bundleno = 49 (0x31), region = 52  ;;  %s298_s10 = sand.u32 (%p1256_p5), 1, %s1151_s13  }
  0x2c   : > { %s1002_s15 = sshll.u32 (%p1256_p5), %s1155_s14, 4  ;;  %s978_s17 = sshll.u32 (%p1256_p5), %s298_s10, 5 }
  0x2d   : > { %s303_s26 = scalar_lea.vmem (%p1256_p5), %s1431_s0, %s1002_s15  ;;  %s300_s29 = scalar_lea.vmem (%p1256_p5), [#allocation3], %s978_s17 }
  0x2e   : > { %v316_v1 = vld [vmem:[%s303_s26] sm:$0xff] (%p1256_p5)  ;;  %v318_v2 = vld [vmem:[%s303_s26 + $0x8] sm:$0xff] (%p1256_p5) }
  0x2f   : > { %v320_v3 = vld [vmem:[%s303_s26 + $0x40] sm:$0xff] (%p1256_p5)  ;;  %317 = vst [vmem:[%s300_s29] sm:$0xff] (%p1256_p5), %v316_v1  ;;  %319 = vst [vmem:[%s300_s29 + $0x8] sm:$0xff] (%p1256_p5), %v318_v2  ;;  %v322_v4 = vld [vmem:[%s303_s26 + $0x48] sm:$0xff] (%p1256_p5) }
  0x30   : > { %321 = vst [vmem:[%s300_s29 + $0x10] sm:$0xff] %v320_v3  ;;  %323 = vst [vmem:[%s300_s29 + $0x18] sm:$0xff] %v322_v4 }
  0x31 PF: > { %332 = sbr.rel (%p1271_p12) target bundleno = 744 (0x2e8), region = 75  ;;  %s1293_s20 = sand.u32 (!%p1271_p12), 1, %s1147_s12  }
  0x32   : > { %s982_s25 = sshll.u32 (!%p1271_p12), %s1293_s20, 5 }
  0x33   : > { %s337_s27 = scalar_lea.vmem (!%p1271_p12), [#allocation3], %s982_s25 }
  0x36   : > { %1134 = dma.done.wait (%p1022_p11), [#allocation5], 512  }
  0x37   : > { %1136 = vsyncadd (%p1022_p11), [#allocation5], 4294966784  ;;  %v1160_v5 = vmov 0.0   ;;  %v1161_v6 = vmov 0   ;;  %v379_v7 = vld [vmem:[%s337_s27 + $0x18] sm:$0xff]  ;;  %v378_v8 = vld [vmem:[%s337_s27 + $0x10] sm:$0xff] }
  0x38   : > { %497 = vmatprep.mubr.f32.mxu1 %v1160_v5  ;;  %485 = vmatprep.mubr.f32.mxu0 %v1160_v5  ;;  %v377_v9 = vld [vmem:[%s337_s27 + $0x8] sm:$0xff]  ;;  %v376_v10 = vld [vmem:[%s337_s27] sm:$0xff]  ;;  %vm408_vm0 = vcmask 130048   ;;  %v387_v13 = vld [vmem:[%s1433_s2 + $0x18] sm:$0xff]  ;;  %vm546_vm1 = vcmask 261120   ;;  %s984_s23 = sshll.u32 %s1293_s20, 1 }
  0x39   : > { %1063 = vset.pattern.permute.xlu0 %v1161_v6  ;;  %1064 = vset.pattern.permute.xlu1 %v1161_v6  ;;  %v382_v11 = vld [vmem:[%s1432_s1 + $0x10] sm:$0xff]  ;;  %v380_v12 = vld [vmem:[%s1432_s1] sm:$0xff]  ;;  %v385_v14 = vld [vmem:[%s1433_s2 + $0x8] sm:$0xff]  ;;  %s1003_s28 = sshll.u32 %s1238_s8, 5  ;;  %s373_s30 = scalar_lea.vmem [#allocation7], %s984_s23 }
  0x3a   : > { %1004 = vmatprep.subr.mxu1 %v379_v7  ;;  %449 = vmatprep.subr.mxu0 %v379_v7  ;;  %v383_v15 = vld [vmem:[%s1432_s1 + $0x18] sm:$0xff]  ;;  %v381_v16 = vld [vmem:[%s1432_s1 + $0x8] sm:$0xff]  ;;  %v386_v17 = vld [vmem:[%s1433_s2 + $0x10] sm:$0xff]  ;;  %s897_s10 = sshll.u32 %s373_s30, 4  ;;  %s895_s18 = scalar_lea.hbm %s1440_s9, %s1003_s28  ;;  %s898_s10 = int_to_ptr.vmem [resolvable:$true] %s897_s10 }
  0x3b   : > { %1006 = vmatpush1.msra.mxu1 %v378_v8  ;;  %450 = vmatpush1.msra.mxu0 %v378_v8  ;;  %v384_v18 = vld [vmem:[%s1433_s2] sm:$0xff]  ;;  %v525_v19 = vld [vmem:[%s1435_s4 + $0x18] sm:$0xff]  ;;  %v524_v20 = vld [vmem:[%s1435_s4 + $0x10] sm:$0xff]  ;;  %s883_s24 = scalar_lea.sflag [#allocation6], %s1293_s20  ;;  %s1091_s26 = scalar_lea.vmem %s898_s10, 32 }
  0x3c   : > { %1005 = vmatprep.subr.mxu1 %v377_v9  ;;  %451 = vmatprep.subr.mxu0 %v377_v9  ;;  %v523_v21 = vld [vmem:[%s1435_s4 + $0x8] sm:$0xff]  ;;  %v522_v22 = vld [vmem:[%s1435_s4] sm:$0xff]  ;;  %v662_v25 = vld [vmem:[%s1437_s6 + $0x10] sm:$0xff]  ;;  %p1092_p5 = scmp.ne.s32.totalorder %s898_s10, %s1091_s26  ;;  %p1446_p6 = scmp.ne.s32.totalorder %s1443_s21, 0 }
  0x3d   : > { %1007 = vmatpush1.msra.mxu1 %v376_v10  ;;  %452 = vmatpush1.msra.mxu0 %v376_v10  ;;  %v660_v23 = vld [vmem:[%s1437_s6] sm:$0xff]  ;;  %v661_v24 = vld [vmem:[%s1437_s6 + $0x8] sm:$0xff]  ;;  %v663_v26 = vld [vmem:[%s1437_s6 + $0x18] sm:$0xff]  ;;  %s1163_s29 = smov [#allocation7]  }
  0x3e   : > { %987 = vmatmul.mubr.msk.f32.vlgmr.msra.gmra.mxu1 %vm408_vm0, %v382_v11  ;;  %985 = vmatmul.mubr.msk.f32.vlgmr.msra.gmra.mxu0 %vm408_vm0, %v380_v12  ;;  %v793_v27 = vld [vmem:[%s1438_s7] sm:$0xff]  ;;  %v794_v28 = vld [vmem:[%s1438_s7 + $0x8] sm:$0xff]  ;;  %v795_v29 = vld [vmem:[%s1438_s7 + $0x10] sm:$0xff]  ;;  %p1093_p10 = pnand %p1092_p5, %p1446_p6  ;;  %s1095_s25 = sshll.u32 %s1163_s29, 4  ;;  %s1096_s25 = int_to_ptr.vmem [resolvable:$false] %s1095_s25 }
  0x3f   : > { %503 = vmatprep.mubr.f32.mxu1 %v1160_v5  ;;  %491 = vmatprep.mubr.f32.mxu0 %v1160_v5  ;;  %v796_v30 = vld [vmem:[%s1438_s7 + $0x18] sm:$0xff]  ;;  %v843_v31 = vld [vmem:[#allocation2] sm:$0x1]  ;;  %v519_v61 = vld [vmem:[%s1434_s3 + $0x8] sm:$0xff]  ;;  %s1097_s8 = scalar_lea.vmem %s1096_s25, 64  ;;  %p1098_p12 = scmp.lt.s32.totalorder %s898_s10, %s1096_s25 }
  0x40   : > { %405 = vperm.xlu0 %1063, %v387_v13   ;;  %395 = vperm.xlu1 %1064, %v385_v14   ;;  %v518_v60 = vld [vmem:[%s1434_s3] sm:$0xff]  ;;  %v520_v62 = vld [vmem:[%s1434_s3 + $0x10] sm:$0xff]  ;;  %v521_v63 = vld [vmem:[%s1434_s3 + $0x18] sm:$0xff]  ;;  %p1094_p11 = pneg %p1093_p10  ;;  %p1099_p13 = scmp.lt.s32.totalorder %s1097_s8, %s1091_s26 }
  0x42   : > { %988 = vmatmul.mubr.msk.f32.gmra.mxu1 %vm408_vm0, %v383_v15  ;;  %986 = vmatmul.mubr.msk.f32.gmra.mxu0 %vm408_vm0, %v381_v16  ;;  %p1100_p0 = por %p1099_p13, %p1098_p12 }
  0x43   : > { %623 = vmatprep.mubr.f32.mxu1 %v1160_v5  ;;  %760 = vmatprep.mubr.f32.mxu0 %v1160_v5 }
  0x44   : > { %400 = vperm.xlu0 %1063, %v386_v17   ;;  %390 = vperm.xlu1 %1064, %v384_v18   ;;  %p1101_p1 = pnand %p1100_p0, %p1094_p11 }
  0x48   : > { %543 = vperm.xlu0 %1063, %v525_v19   ;;  %538 = vperm.xlu1 %1064, %v524_v20  }
  0x4c   : > { %533 = vperm.xlu0 %1063, %v523_v21   ;;  %528 = vperm.xlu1 %1064, %v522_v22  }
  0x50   : > { %666 = vperm.xlu0 %1063, %v660_v23   ;;  %671 = vperm.xlu1 %1064, %v661_v24  }
  0x54   : > { %676 = vperm.xlu0 %1063, %v662_v25   ;;  %681 = vperm.xlu1 %1064, %v663_v26  }
  0x58   : > { %799 = vperm.xlu0 %1063, %v793_v27   ;;  %804 = vperm.xlu1 %1064, %v794_v28  }
  0x5c   : > { %809 = vperm.xlu0 %1063, %v795_v29   ;;  %814 = vperm.xlu1 %1064, %v796_v30   ;;  %v656_v29 = vld [vmem:[#allocation4] sm:$0xff]  ;;  %v657_v30 = vld [vmem:[#allocation4 + $0x8] sm:$0xff] }
  0x60   : > { %846 = vperm.xlu0 %1063, %v843_v31   ;;  %v658_v31 = vld [vmem:[#allocation4 + $0x10] sm:$0xff] }
  0xbb   : > { %v406_v32 = vpop.permute.xlu0 %405  ;;  %v396_v37 = vpop.permute.xlu1 %395 }
  0xbf   : > { %v401_v40 = vpop.permute.xlu0 %400  ;;  %v391_v49 = vpop.permute.xlu1 %390 }
  0xc3   : > { %v544_v6 = vpop.permute.xlu0 %543  ;;  %v539_v8 = vpop.permute.xlu1 %538 }
  0xc7   : > { %v534_v14 = vpop.permute.xlu0 %533  ;;  %v529_v18 = vpop.permute.xlu1 %528 }
  0xfe   : > { %v499_v33 = vpop.f32.mrf.mxu1  ;;  %v487_v34 = vpop.f32.mrf.mxu0 }
  0xff   : > { %v500_v46 = vadd.f32 %v499_v33, %v401_v40  ;;  %v488_v55 = vadd.f32 %v487_v34, %v391_v49  ;;  %v667_v33 = vpop.permute.xlu0 %666  ;;  %v672_v34 = vpop.permute.xlu1 %671 }
 0x100   : > { %v501_v35 = vpop.f32.mrf.mxu1  ;;  %v489_v36 = vpop.f32.mrf.mxu0 }
 0x101   : > { %v502_v44 = vadd.f32 %v501_v35, %v401_v40  ;;  %v490_v53 = vadd.f32 %v489_v36, %v391_v49  ;;  %v514_v54 = vmax.f32 %v500_v46, 0.0  ;;  %v510_v59 = vmax.f32 %v488_v55, 0.0 }
 0x102   : > { %v505_v38 = vpop.f32.mrf.mxu1  ;;  %v493_v39 = vpop.f32.mrf.mxu0 }
 0x103   : > { %v506_v41 = vadd.f32 %v505_v38, %v406_v32  ;;  %v494_v51 = vadd.f32 %v493_v39, %v396_v37  ;;  %v515_v52 = vmax.f32 %v502_v44, 0.0  ;;  %v511_v58 = vmax.f32 %v490_v53, 0.0  ;;  %v677_v35 = vpop.permute.xlu0 %676  ;;  %v682_v38 = vpop.permute.xlu1 %681 }
 0x104   : > { %v507_v42 = vpop.f32.mrf.mxu1  ;;  %v495_v43 = vpop.f32.mrf.mxu0 }
 0x105   : > { %v508_v45 = vadd.f32 %v507_v42, %v406_v32  ;;  %v496_v48 = vadd.f32 %v495_v43, %v396_v37  ;;  %v516_v50 = vmax.f32 %v506_v41, 0.0  ;;  %v512_v57 = vmax.f32 %v494_v51, 0.0  ;;  %v659_v32 = vld [vmem:[#allocation4 + $0x18] sm:$0xff] }
 0x107   : > { %v517_v47 = vmax.f32 %v508_v45, 0.0  ;;  %v513_v56 = vmax.f32 %v496_v48, 0.0  ;;  %v800_v42 = vpop.permute.xlu0 %799 }
 0x109   : > { %583 = vmatprep.subr.mxu1 %v517_v47 }
 0x10a   : > { %584 = vmatpush1.msra.mxu1 %v516_v50  ;;  %v805_v50 = vpop.permute.xlu1 %804 }
 0x10b   : > { %585 = vmatprep.subr.mxu1 %v515_v52 }
 0x10c   : > { %586 = vmatpush1.msra.mxu1 %v514_v54 }
 0x10d   : > { %587 = vmatprep.subr.mxu1 %v513_v56  ;;  %v810_v56 = vpop.permute.xlu0 %809 }
 0x10e   : > { %588 = vmatpush1.msra.mxu1 %v512_v57 }
 0x10f   : > { %589 = vmatprep.subr.mxu1 %v511_v58 }
 0x110   : > { %590 = vmatpush1.msra.mxu1 %v510_v59 }
 0x111   : > { %989 = vmatmul.mubr.msk.f32.vlgmr.msra.gmra.mxu1 %vm546_vm1, %v518_v60 }
 0x112   : > { %629 = vmatprep.mubr.f32.mxu1 %v1160_v5 }
 0x115   : > { %990 = vmatmul.mubr.msk.f32.gmra.mxu1 %vm546_vm1, %v519_v61 }
 0x116   : > { %635 = vmatprep.mubr.f32.mxu1 %v1160_v5 }
 0x119   : > { %991 = vmatmul.mubr.msk.f32.gmra.mxu1 %vm546_vm1, %v520_v62 }
 0x11a   : > { %641 = vmatprep.mubr.f32.mxu1 %v1160_v5 }
 0x11d   : > { %992 = vmatmul.mubr.msk.f32.gmra.mxu1 %vm546_vm1, %v521_v63 }
 0x1d1   : > { %v625_v0 = vpop.f32.mrf.mxu1 }
 0x1d2   : > { %v626_v23 = vadd.f32 %v625_v0, %v529_v18 }
 0x1d3   : > { %v627_v1 = vpop.f32.mrf.mxu1 }
 0x1d4   : > { %v628_v21 = vadd.f32 %v627_v1, %v529_v18  ;;  %v648_v28 = vmax.f32 %v626_v23, 0.0 }
 0x1d5   : > { %v631_v2 = vpop.f32.mrf.mxu1 }
 0x1d6   : > { %v632_v19 = vadd.f32 %v631_v2, %v534_v14  ;;  %v649_v27 = vmax.f32 %v628_v21, 0.0 }
 0x1d7   : > { %v633_v3 = vpop.f32.mrf.mxu1 }
 0x1d8   : > { %v634_v16 = vadd.f32 %v633_v3, %v534_v14  ;;  %v650_v26 = vmax.f32 %v632_v19, 0.0 }
 0x1d9   : > { %v637_v4 = vpop.f32.mrf.mxu1 }
 0x1da   : > { %v638_v15 = vadd.f32 %v637_v4, %v539_v8  ;;  %v651_v25 = vmax.f32 %v634_v16, 0.0 }
 0x1db   : > { %v639_v7 = vpop.f32.mrf.mxu1 }
 0x1dc   : > { %v640_v12 = vadd.f32 %v639_v7, %v539_v8  ;;  %v652_v24 = vmax.f32 %v638_v15, 0.0 }
 0x1dd   : > { %v643_v9 = vpop.f32.mrf.mxu1 }
 0x1de   : > { %v644_v10 = vadd.f32 %v643_v9, %v544_v6  ;;  %v653_v22 = vmax.f32 %v640_v12, 0.0 }
 0x1df   : > { %v645_v11 = vpop.f32.mrf.mxu1 }
 0x1e0   : > { %v646_v13 = vadd.f32 %v645_v11, %v544_v6  ;;  %v654_v20 = vmax.f32 %v644_v10, 0.0  ;;  %v815_v6 = vpop.permute.xlu1 %814  ;;  %v849_v11 = vlaneseq }
 0x1e2   : > { %v655_v17 = vmax.f32 %v646_v13, 0.0  ;;  %vm879_vm2 = vcmp.lt.s32.totalorder %v849_v11, 256 }
 0x1e4   : > { %720 = vmatprep.subr.mxu0 %v655_v17  ;;  %v850_v17 = vshrl.u32 %v849_v11, 7 }
 0x1e5   : > { %721 = vmatpush1.msra.mxu0 %v654_v20 }
 0x1e6   : > { %722 = vmatprep.subr.mxu0 %v653_v22  ;;  %v851_v22 = vsub.s32 0, %v850_v17 }
 0x1e7   : > { %723 = vmatpush1.msra.mxu0 %v652_v24 }
 0x1e8   : > { %724 = vmatprep.subr.mxu0 %v651_v25  ;;  %v847_v25 = vpop.permute.xlu0 %846 }
 0x1e9   : > { %725 = vmatpush1.msra.mxu0 %v650_v26 }
 0x1ea   : > { %726 = vmatprep.subr.mxu0 %v649_v27 }
 0x1eb   : > { %727 = vmatpush1.msra.mxu0 %v648_v28  ;;  %v1162_v28 = vmov 1966171168  }
 0x1ec   : > { %993 = vmatmul.mubr.msk.f32.vlgmr.msra.gmra.mxu0 %vm546_vm1, %v656_v29  ;;  %v863_v29 = vunpack.c.l.s4 %v1162_v28 }
 0x1ed   : > { %766 = vmatprep.mubr.f32.mxu0 %v1160_v5 }
 0x1f0   : > { %994 = vmatmul.mubr.msk.f32.gmra.mxu0 %vm546_vm1, %v657_v30  ;;  %v852_v30 = vrot.slane %v847_v25, %v851_v22 }
 0x1f1   : > { %772 = vmatprep.mubr.f32.mxu0 %v1160_v5 }
 0x1f4   : > { %995 = vmatmul.mubr.msk.f32.gmra.mxu0 %vm546_vm1, %v658_v31 }
 0x1f5   : > { %778 = vmatprep.mubr.f32.mxu0 %v1160_v5 }
 0x1f8   : > { %996 = vmatmul.mubr.msk.f32.gmra.mxu0 %vm546_vm1, %v659_v32 }
 0x2ac   : > { %v762_v36 = vpop.f32.mrf.mxu0 }
 0x2ad   : > { %v763_v39 = vadd.f32 %v762_v36, %v667_v33 }
 0x2ae   : > { %v764_v37 = vpop.f32.mrf.mxu0 }
 0x2af   : > { %v765_v43 = vadd.f32 %v764_v37, %v667_v33  ;;  %v785_v47 = vmax.f32 %v763_v39, 0.0 }
 0x2b0   : > { %v768_v40 = vpop.f32.mrf.mxu0 }
 0x2b1   : > { %v769_v41 = vadd.f32 %v768_v40, %v672_v34  ;;  %v786_v51 = vmax.f32 %v765_v43, 0.0  ;;  %v817_v57 = vmul.f32 %v800_v42, %v785_v47 }
 0x2b2   : > { %v770_v44 = vpop.f32.mrf.mxu0 }
 0x2b3   : > { %v787_v45 = vmax.f32 %v769_v41, 0.0  ;;  %v771_v46 = vadd.f32 %v770_v44, %v672_v34  ;;  %v818_v63 = vmul.f32 %v800_v42, %v786_v51 }
 0x2b4   : > { %v774_v48 = vpop.f32.mrf.mxu0 }
 0x2b5   : > { %v788_v5 = vmax.f32 %v771_v46, 0.0  ;;  %v775_v49 = vadd.f32 %v774_v48, %v677_v35  ;;  %v819_v53 = vmul.f32 %v805_v50, %v787_v45 }
 0x2b6   : > { %v776_v52 = vpop.f32.mrf.mxu0 }
 0x2b7   : > { %v789_v54 = vmax.f32 %v775_v49, 0.0  ;;  %v777_v55 = vadd.f32 %v776_v52, %v677_v35  ;;  %v820_v59 = vmul.f32 %v805_v50, %v788_v5  ;;  %v825_v1 = vadd.f32 %v819_v53, %v817_v57 }
 0x2b8   : > { %v780_v58 = vpop.f32.mrf.mxu0  ;;  %v864_v35 = vunpack.c.0.s8 %v863_v29 }
 0x2b9   : > { %v821_v60 = vmul.f32 %v810_v56, %v789_v54  ;;  %v790_v61 = vmax.f32 %v777_v55, 0.0  ;;  %v781_v62 = vadd.f32 %v780_v58, %v682_v38  ;;  %v834_v7 = vadd.f32 %v820_v59, %v818_v63 }
 0x2ba   : > { %v782_v0 = vpop.f32.mrf.mxu0  ;;  %v867_v39 = vsub.s32 %v864_v35, %v850_v17 }
 0x2bb   : > { %v822_v2 = vmul.f32 %v810_v56, %v790_v61  ;;  %v791_v3 = vmax.f32 %v781_v62, 0.0  ;;  %v783_v4 = vadd.f32 %v782_v0, %v682_v38  ;;  %v826_v8 = vadd.f32 %v825_v1, %v821_v60 }
 0x2bd   : > { %v823_v9 = vmul.f32 %v815_v6, %v791_v3  ;;  %v792_v10 = vmax.f32 %v783_v4, 0.0  ;;  %v835_v12 = vadd.f32 %v834_v7, %v822_v2 }
 0x2bf   : > { %v827_v13 = vadd.f32 %v826_v8, %v823_v9  ;;  %v824_v14 = vmul.f32 %v815_v6, %v792_v10 }
 0x2c1   : > { %v828_v15 = vrot.slane %v827_v13, 4  ;;  %v836_v16 = vadd.f32 %v835_v12, %v824_v14 }
 0x2c3   : > { %v829_v18 = vadd.f32 %v828_v15, %v827_v13  ;;  %v837_v19 = vrot.slane %v836_v16, 4 }
 0x2c5   : > { %v830_v20 = vrot.slane %v829_v18, 2  ;;  %v838_v21 = vadd.f32 %v837_v19, %v836_v16 }
 0x2c7   : > { %v831_v23 = vadd.f32 %v830_v20, %v829_v18  ;;  %v839_v24 = vrot.slane %v838_v21, 2 }
 0x2c9   : > { %v832_v26 = vrot.slane %v831_v23, 1  ;;  %v840_v27 = vadd.f32 %v839_v24, %v838_v21 }
 0x2cb   : > { %v833_v31 = vadd.f32 %v832_v26, %v831_v23  ;;  %v841_v32 = vrot.slane %v840_v27, 1 }
 0x2cd   : > { %v853_v33 = vadd.f32 %v852_v30, %v833_v31  ;;  %v842_v34 = vadd.f32 %v841_v32, %v840_v27 }
 0x2cf   : > { %v855_v36 = vmax.f32 %v853_v33, 0.0  ;;  %v854_v37 = vadd.f32 %v852_v30, %v842_v34 }
 0x2d1   : > { %v856_v38 = vmax.f32 %v854_v37, 0.0  ;;  %v857_v40 = vmin.f32 %v855_v36, 1.0 }
 0x2d3   : > { %v858_v41 = vmin.f32 %v856_v38, 1.0 }
 0x2d5   : > { %v861_v42 = vcombine.low %v857_v40, %v858_v41 }
 0x2d7   : > { %v868_v43 = vrot.slane %v861_v42, %v867_v39 }
 0x2d9   : > { %v875_v44 = vrot.slane %v868_v43, %v867_v39 }
 0x2db   : > { %881 = vst.msk [vmem:[%s373_s30] sm:$0x3] %vm879_vm2, %v875_v44 }
 0x2dc   : > { %1104 = shalt.err (!%p1101_p1)
}
 0x2dd   : > { %s1105_s27 = scalar_lea.hbm %s895_s18, 32  ;;  %s1109_s28 = scalar_lea.hbm %s1440_s9, 128 }
 0x2de   : > { %p1106_p2 = scmp.ne.s32.totalorder %s895_s18, %s1105_s27  ;;  %p1110_p7 = scmp.lt.s32.totalorder %s895_s18, %s1440_s9 }
 0x2df   : > { %p1111_p8 = scmp.lt.s32.totalorder %s1109_s28, %s1105_s27 }
 0x2e0   : > { %p1107_p3 = pnand %p1106_p2, %p1446_p6 }
 0x2e1   : > { %p1112_p9 = por %p1111_p8, %p1110_p7 }
 0x2e2   : > { %p1108_p4 = pneg %p1107_p3 }
 0x2e4   : > { %p1113_p5 = pnand %p1112_p9, %p1108_p4 }
 0x2e6   : > { %1116 = shalt.err (!%p1113_p5)
}
 0x2e7   : > { %1012 = dma.vmem_to_hbm [thread:$0]  (%p1446_p6), %s898_s10, 32, %s895_s18, %s883_s24  }
 0x2e8 PF: > { %p1024_p10 = scmp.ge.s32.totalorder %s1155_s14, 2  ;;  %s909_s17 = sand.u32 1, %s1143_s11  }
 0x2e9   : > { %p1447_p11 = scmp.ne.s32.totalorder %s1444_s22, 0  ;;  %s910_s26 = scalar_lea.sflag [#allocation6], %s909_s17 }
 0x2eb   : > { %p1019_p12 = pnand %p1024_p10, %p1447_p11 }
 0x2ed   : > { %p1020_p13 = pneg %p1019_p12 }
 0x2ef   : > { %1138 = dma.done.wait (%p1020_p13), %s910_s26, 32  }
 0x2f0   : > { %1140 = vsyncadd (%p1020_p13), %s910_s26, 4294967264  ;;  %p22_p0 = scmp.ge.s32.totalorder %s1242_s16, 6   ;;  %s1448_s11 = smov %s1147_s12 }
 0x2f1   : > { %s1449_s12 = smov %s1151_s13  ;;  %s1450_s13 = smov %s1254_s19 }
 0x2f2   : > { %s1451_s14 = smov %s1242_s16  ;;  %24 = sbr.rel (!%p22_p0) target bundleno = 7 (0x7), region = 124 }
 0x2f7   :  { %915 = vsyncpa [#allocation5], 1 }
 0x2f8   :  { %917 = vsyncpa [#allocation5 + $0x1], 1 }
 0x2f9   :  { %918 = vsyncpa [#allocation6], 1 }
 0x2fa   :  { %920 = vsyncpa [#allocation6 + $0x1], 1 }

</bundles_post_ra>
